<compile_context>
chip_gen: v5e
topology: v5e:2x2
jax: 0.10.0
libtpu: 0.0.40
codegen_flags: <defaults>
</compile_context>

<pallas_src>
import functools

import jax
import jax.numpy as jnp
from jax.experimental import pallas as pl
from jax.experimental.pallas import tpu as pltpu


def _interp_matrix(out_size: int, in_size: int, mode: str, align_corners: bool):
    """1-D separable interpolation matrix (out_size, in_size), matching
    torch.nn.functional.interpolate index/weight semantics (f32)."""
    dst = jnp.arange(out_size, dtype=jnp.float32)
    if mode == "nearest":
        # torch legacy 'nearest': src = floor(dst * in/out); align_corners ignored.
        idx = jnp.clip(jnp.floor(dst * (in_size / out_size)).astype(jnp.int32),
                       0, in_size - 1)
        return jax.nn.one_hot(idx, in_size, dtype=jnp.float32)
    if mode == "bilinear":
        if align_corners:
            if out_size > 1:
                src = dst * ((in_size - 1) / (out_size - 1))
            else:
                src = jnp.zeros_like(dst)
        else:
            src = jnp.maximum((dst + 0.5) * (in_size / out_size) - 0.5, 0.0)
        x0 = jnp.clip(jnp.floor(src).astype(jnp.int32), 0, in_size - 1)
        x1 = jnp.minimum(x0 + 1, in_size - 1)
        frac = src - x0.astype(jnp.float32)
        return (jax.nn.one_hot(x0, in_size, dtype=jnp.float32) * (1.0 - frac)[:, None]
                + jax.nn.one_hot(x1, in_size, dtype=jnp.float32) * frac[:, None])
    # TODO(synk): bicubic / area / nearest-exact / antialias and torch's 3-D
    # 'linear' mode are not implemented (torch 'linear' is 3-D-only anyway).
    raise NotImplementedError(f"mode={mode!r} not supported for 4-D NCHW input")


def _vmem_budget_and_limit():
    """Generation-aware VMEM sizing (v5e/v6e 128 MiB, v7x 64 MiB per core)."""
    try:
        cap = int(pltpu.get_tpu_info().vmem_capacity_bytes)
    except Exception:
        cap = 64 * 1024 * 1024  # conservative fallback (v7x per-TC capacity)
    limit = min((cap * 3) // 4, 96 * 1024 * 1024)   # scoped-VMEM limit we request
    budget = (limit * 3) // 4                       # what the block picker may use
    return budget, limit


def _pick_channel_batch(nc, h, w, h_out, w_out, itemsize, vmem_budget):
    """How many channels to process per grid step.

    Targets ~4 MiB of HBM traffic per step (per-step overhead amortization),
    fits double-buffered I/O blocks + f32 intermediates in the VMEM budget
    (with (8,128) tile padding), and keeps >= 2 grid steps so the "parallel"
    grid axis can shard across both v7x TensorCores.
    """
    def pad(v, m):
        return -(-v // m) * m

    in_blk = pad(h, 8) * pad(w, 128) * itemsize            # x block (double-buffered)
    out_blk = pad(h_out, 8) * pad(w_out, 128) * itemsize   # o block (double-buffered)
    # Kernel-body intermediates per channel (transposed input, two f32 matmul
    # outputs, transposed intermediate). Counted generously; Mosaic may reuse.
    scratch = (pad(w, 8) * pad(h, 128) * max(itemsize, 4)
               + pad(w, 8) * pad(h_out, 128) * 4
               + pad(h_out, 8) * pad(w, 128) * 4
               + pad(h_out, 8) * pad(w_out, 128) * 4)

    def footprint(b):
        return 2 * b * (in_blk + out_blk) + b * scratch + (1 << 20)  # +weights/headroom

    moved = (h * w + h_out * w_out) * itemsize      # HBM bytes actually moved per channel
    b = max(1, min(nc, (4 << 20) // max(1, moved)))  # ~4 MiB moved per grid step
    while b > 1 and footprint(b) > vmem_budget:
        b -= 1
    if nc >= 2:
        b = min(b, -(-nc // 2))          # guarantee >= 2 grid steps (v7x megacore)
    if (-(-nc // 8)) * moved >= (1 << 20):
        b = min(b, -(-nc // 8))          # prefer >= 8 steps while >= 1 MiB/step remains
    return max(1, b)


def _interp_kernel(x_ref, wht_ref, wwt_ref, o_ref):
    # x_ref:   (B, H, W)          one group of channels, natural NCHW layout
    # wht_ref: (H, H_out)  f32    row-interpolation matrix (transposed)
    # wwt_ref: (W, W_out)  f32    column-interpolation matrix (transposed)
    # o_ref:   (B, H_out, W_out)
    b, h, w = x_ref.shape
    h_out = wht_ref.shape[1]
    w_out = wwt_ref.shape[1]

    # Row (H) interpolation: put H on the lane axis and contract it on the MXU.
    xt = jnp.transpose(x_ref[...], (0, 2, 1)).reshape(b * w, h)          # (B*W, H)
    t = jnp.dot(xt, wht_ref[...], preferred_element_type=jnp.float32)     # (B*W, H_out) f32
    t = jnp.transpose(t.reshape(b, w, h_out), (0, 2, 1))                  # (B, H_out, W) f32

    # Column (W) interpolation.
    y = jnp.dot(t.reshape(b * h_out, w), wwt_ref[...],
                preferred_element_type=jnp.float32)                       # (B*H_out, W_out) f32
    o_ref[...] = y.reshape(b, h_out, w_out).astype(o_ref.dtype)


@functools.partial(jax.jit, static_argnames=("scale_factor", "mode", "align_corners"))
def interpolate(x, *, scale_factor, mode="bilinear", align_corners=False):
    """Pallas equivalent of Interpolate(scale_factor, mode, align_corners)(x).

    x: (N, C, H, W) array (NCHW, same as the PyTorch module).
    scale_factor: float/int or (sf_h, sf_w) tuple; output size uses floor,
    matching torch.
    """
    if x.ndim != 4:
        raise ValueError("expected NCHW (4-D) input")
    N, C, H, W = x.shape
    if isinstance(scale_factor, (tuple, list)):
        sf_h, sf_w = scale_factor
    else:
        sf_h = sf_w = scale_factor
    H_out, W_out = int(H * sf_h), int(W * sf_w)
    if H_out <= 0 or W_out <= 0:
        raise ValueError("scale_factor too small for input spatial size")

    nc = N * C
    itemsize = jnp.dtype(x.dtype).itemsize
    vmem_budget, vmem_limit = _vmem_budget_and_limit()
    B = _pick_channel_batch(nc, H, W, H_out, W_out, itemsize, vmem_budget)
    G = -(-nc // B)   # ragged last block: Pallas pads reads / drops OOB writes,
                      # and channels are independent, so padding is harmless.

    # f32 interpolation matrices, transposed so the kernel contracts on lanes.
    # TODO(synk): integer-scale 'nearest' could skip the MXU entirely with a
    # pure replicate path; with the O(B) weights it is already memory-bound.
    wht = _interp_matrix(H_out, H, mode, align_corners).T    # (H, H_out)
    wwt = _interp_matrix(W_out, W, mode, align_corners).T    # (W, W_out)

    x3 = x.reshape(nc, H, W)    # free reshape; no extra HBM transpose passes
    out3 = pl.pallas_call(
        _interp_kernel,
        out_shape=jax.ShapeDtypeStruct((nc, H_out, W_out), x.dtype),
        grid_spec=pltpu.PrefetchScalarGridSpec(
            num_scalar_prefetch=0,
            grid=(G,),
            in_specs=[
                pl.BlockSpec((B, H, W), lambda i: (i, 0, 0)),
                pl.BlockSpec((H, H_out), lambda i: (0, 0)),
                pl.BlockSpec((W, W_out), lambda i: (0, 0)),
            ],
            out_specs=pl.BlockSpec((B, H_out, W_out), lambda i: (i, 0, 0)),
        ),
        compiler_params=pltpu.CompilerParams(
            dimension_semantics=("parallel",),
            vmem_limit_bytes=int(vmem_limit)),
    )(x3, wht, wwt)
    return out3.reshape(N, C, H_out, W_out)


if __name__ == "__main__":
    key = jax.random.PRNGKey(0)
    k1, k2 = jax.random.split(key)

    # DPT usage: Interpolate(scale_factor=2, mode="bilinear", align_corners=True)
    x = jax.random.normal(k1, (2, 4, 16, 16), dtype=jnp.float32)
    y = interpolate(x, scale_factor=2, mode="bilinear", align_corners=True)
    jax.block_until_ready(y)
    assert y.shape == (2, 4, 32, 32), y.shape
    assert y.dtype == x.dtype

    wh = _interp_matrix(32, 16, "bilinear", True)
    ww = _interp_matrix(32, 16, "bilinear", True)
    ref = jnp.einsum("oh,nchw,pw->ncop", wh, x, ww)
    assert jnp.allclose(y, ref, atol=1e-4, rtol=1e-4), float(jnp.max(jnp.abs(y - ref)))

    # align_corners=False + ragged channel grid (N*C = 7 -> B=4, partial last block)
    x2 = jax.random.normal(k2, (1, 7, 16, 16), dtype=jnp.float32)
    y2 = interpolate(x2, scale_factor=2, mode="bilinear", align_corners=False)
    jax.block_until_ready(y2)
    wh2 = _interp_matrix(32, 16, "bilinear", False)
    ww2 = _interp_matrix(32, 16, "bilinear", False)
    ref2 = jnp.einsum("oh,nchw,pw->ncop", wh2, x2, ww2)
    assert jnp.allclose(y2, ref2, atol=1e-4, rtol=1e-4), float(jnp.max(jnp.abs(y2 - ref2)))

    # nearest with integer scale == pure 2x replicate
    y3 = interpolate(x, scale_factor=2, mode="nearest", align_corners=False)
    jax.block_until_ready(y3)
    ref3 = jnp.repeat(jnp.repeat(x, 2, axis=2), 2, axis=3)
    assert jnp.allclose(y3, ref3, atol=1e-5), float(jnp.max(jnp.abs(y3 - ref3)))

    # bf16 input: weights & accumulation stay f32 in-kernel (only I/O rounding)
    xb = x.astype(jnp.bfloat16)
    y4 = interpolate(xb, scale_factor=2, mode="bilinear", align_corners=True)
    jax.block_until_ready(y4)
    assert y4.dtype == jnp.bfloat16
    ref4 = jnp.einsum("oh,nchw,pw->ncop", wh, xb.astype(jnp.float32), ww)
    assert jnp.allclose(y4.astype(jnp.float32), ref4, atol=5e-2, rtol=5e-2), \
        float(jnp.max(jnp.abs(y4.astype(jnp.float32) - ref4)))

    print("KERNEL_OK")
</pallas_src>

<mosaic_0001>
module attributes {stable_mosaic.version = 11 : i64} {
  func.func @_interp_kernel(%arg0: i32, %arg1: memref<4x16x16xf32, #tpu.memory_space<vmem>>, %arg2: memref<16x32xf32, #tpu.memory_space<vmem>>, %arg3: memref<16x32xf32, #tpu.memory_space<vmem>>, %arg4: memref<4x32x32xf32, #tpu.memory_space<vmem>>) attributes {dimension_semantics = [#tpu.dimension_semantics<parallel>], iteration_bounds = array<i64: 2>, scalar_prefetch = 0 : i64, scratch_operands = 0 : i64, tpu.core_type = #tpu.core_type<tc>, window_params = [{transform_indices = @transform_0, window_bounds = array<i64: 4, 16, 16>}, {pipeline_mode = #tpu.pipeline_mode<synchronous>, transform_indices = @transform_1, window_bounds = array<i64: 16, 32>}, {pipeline_mode = #tpu.pipeline_mode<synchronous>, transform_indices = @transform_2, window_bounds = array<i64: 16, 32>}, {transform_indices = @transform_3, window_bounds = array<i64: 4, 32, 32>}]} {
    %c0 = arith.constant 0 : index
    %c0_0 = arith.constant 0 : index
    %c0_1 = arith.constant 0 : index
    %0 = vector.load %arg1[%c0, %c0_0, %c0_1] : memref<4x16x16xf32, #tpu.memory_space<vmem>>, vector<4x16x16xf32>
    %1 = tpu.transpose %0, [0, 2, 1] : vector<4x16x16xf32> -> vector<4x16x16xf32>
    %2 = vector.shape_cast %1 : vector<4x16x16xf32> to vector<64x16xf32>
    %c0_2 = arith.constant 0 : index
    %c0_3 = arith.constant 0 : index
    %3 = vector.load %arg2[%c0_2, %c0_3] : memref<16x32xf32, #tpu.memory_space<vmem>>, vector<16x32xf32>
    %cst = arith.constant dense<0.000000e+00> : vector<64x32xf32>
    %4 = tpu.matmul %2, %3, %cst {dimension_numbers = #tpu.dot_dimension_numbers<[1], [0], [0], [1], [0, 0, 1, 1], [], []>} : vector<64x16xf32>, vector<16x32xf32>, vector<64x32xf32> -> vector<64x32xf32>
    %5 = vector.shape_cast %4 : vector<64x32xf32> to vector<4x16x32xf32>
    %6 = tpu.transpose %5, [0, 2, 1] : vector<4x16x32xf32> -> vector<4x32x16xf32>
    %7 = vector.shape_cast %6 : vector<4x32x16xf32> to vector<128x16xf32>
    %c0_4 = arith.constant 0 : index
    %c0_5 = arith.constant 0 : index
    %8 = vector.load %arg3[%c0_4, %c0_5] : memref<16x32xf32, #tpu.memory_space<vmem>>, vector<16x32xf32>
    %cst_6 = arith.constant dense<0.000000e+00> : vector<128x32xf32>
    %9 = tpu.matmul %7, %8, %cst_6 {dimension_numbers = #tpu.dot_dimension_numbers<[1], [0], [0], [1], [0, 0, 1, 1], [], []>} : vector<128x16xf32>, vector<16x32xf32>, vector<128x32xf32> -> vector<128x32xf32>
    %10 = vector.shape_cast %9 : vector<128x32xf32> to vector<4x32x32xf32>
    %c0_7 = arith.constant 0 : index
    %c0_8 = arith.constant 0 : index
    %c0_9 = arith.constant 0 : index
    %11 = vector.load %arg4[%c0_7, %c0_8, %c0_9] : memref<4x32x32xf32, #tpu.memory_space<vmem>>, vector<4x32x32xf32>
    tpu.vector_store %arg4[%c0_7, %c0_8, %c0_9], %10 {strides = array<i32>} : memref<4x32x32xf32, #tpu.memory_space<vmem>>, vector<4x32x32xf32>,
    return
  }
  func.func @transform_0(%arg0: i32) -> (i32, i32, i32) {
    %c0_i32 = arith.constant 0 : i32
    %c0_i32_0 = arith.constant 0 : i32
    %c0_i32_1 = arith.constant 0 : i32
    return %arg0, %c0_i32, %c0_i32_0 : i32, i32, i32
  }
  func.func @transform_1(%arg0: i32) -> (i32, i32) {
    %c0_i32 = arith.constant 0 : i32
    %c0_i32_0 = arith.constant 0 : i32
    %c0_i32_1 = arith.constant 0 : i32
    return %c0_i32, %c0_i32_0 : i32, i32
  }
  func.func @transform_2(%arg0: i32) -> (i32, i32) {
    %c0_i32 = arith.constant 0 : i32
    %c0_i32_0 = arith.constant 0 : i32
    %c0_i32_1 = arith.constant 0 : i32
    return %c0_i32, %c0_i32_0 : i32, i32
  }
  func.func @transform_3(%arg0: i32) -> (i32, i32, i32) {
    %c0_i32 = arith.constant 0 : i32
    %c0_i32_0 = arith.constant 0 : i32
    %c0_i32_1 = arith.constant 0 : i32
    return %arg0, %c0_i32, %c0_i32_0 : i32, i32, i32
  }
}

</mosaic_0001>

<bundles_post_ra>
// kernel: interpolate.1
= control target key start
LH: loop header
LB: loop body
LE: loop exit
PB: predicated region body
PF: predicated region fallthrough
CT: control target
= control target key end

     0   :  { %8 = vsyncpa [#allocation3], 0  ;;  %s1170_s0 = inlined_call_operand.hbm [shape: f32[8,16,16], index: 0, kind: input, shape index: {}]   ;;  %s1171_s1 = inlined_call_operand.vmem [shape: f32[16,32], index: 1, kind: input, shape index: {}, may-alias: {1,2}]   ;;  %s1172_s2 = inlined_call_operand.vmem [shape: f32[16,32], index: 2, kind: input, shape index: {}, may-alias: {1,2}]   ;;  %s1173_s3 = inlined_call_operand.hbm [shape: f32[8,32,32], index: 3, kind: output, shape index: {}]  }
   0x1   :  { %10 = vsyncpa [#allocation3 + $0x1], 0 }
   0x2   :  { %11 = vsyncpa [#allocation4], 0 }
   0x3   :  { %13 = vsyncpa [#allocation4 + $0x1], 0  ;;  %s971_s12 = smov 0   ;;  %s973_s13 = smov 0  }
   0x4   :  { %s975_s14 = smov 0   ;;  %s977_s15 = smov 0  }
   0x5 LB: > { %s992_s16 = sadd.s32 4294967295, %s945_s15   ;;  %s748_s17 = sadd.s32 4294967294, %s945_s15   ;;  %s945_s15 = sphi %s977_s15, %s1183_s15   ;;  %s941_s14 = sphi %s975_s14, %s1182_s14   ;;  %s937_s13 = sphi %s973_s13, %s1181_s13   ;;  %s933_s12 = sphi %s971_s12, %s1180_s12  }
   0x6   : > { %s996_s18 = sadd.s32 1, %s945_s15   ;;  %s26_s19 = sadd.s32 1, %s941_s14 }
   0x7   : > { %s23_s20 = ssub.s32 %s945_s15, %s996_s18  ;;  %p33_p0 = scmp.ne.s32.totalorder %s941_s14, %s937_s13 }
   0x8   : > { %p24_p1 = scmp.eq.s32.totalorder %s23_s20, 0  ;;  %p34_p2 = scmp.eq.s32.totalorder %s945_s15, 0 }
   0x9   : > { %p39_p3 = scmp.ne.s32.totalorder %s937_s13, %s933_s12  ;;  %p40_p4 = scmp.eq.s32.totalorder %s992_s16, 0 }
   0xa   : > { %s1008_s21 = scalar_select %p24_p1, %s941_s14, %s26_s19  }
   0xb   : > { %p1010_p5 = por %p34_p2, %p33_p0  ;;  %p1014_p6 = por %p40_p4, %p39_p3 }
   0xc   : > { %p105_p7 = scmp.eq.s32.totalorder %s992_s16, 1  ;;  %p111_p8 = scmp.eq.s32.totalorder %s748_s17, 1 }
   0xd   : > { %p810_p10 = scmp.lt.s32.totalorder %s945_s15, 2  ;;  %s137_s26 = sand.u32 1, %s941_s14  }
   0xe   : > { %p1021_p11 = por %p105_p7, %p33_p0  ;;  %p1025_p12 = por %p111_p8, %p39_p3 }
   0xf   : > { %s789_s27 = sshll.u32 %s945_s15, 6  ;;  %s751_s28 = sshll.u32 %s137_s26, 6 }
  0x10   : > { %s147_s4 = scalar_lea.hbm %s1170_s0, %s789_s27  ;;  %s141_s6 = scalar_lea.vmem [#allocation2], %s751_s28 }
  0x11   : > { %s148_s5 = sshll.u32 %s147_s4, 4  ;;  %s150_s7 = sshll.u32 %s141_s6, 4  ;;  %s149_s5 = int_to_ptr.hbm [resolvable:$true] %s148_s5  ;;  %s151_s7 = int_to_ptr.vmem [resolvable:$true] %s150_s7 }
  0x12   : > { %p1036_p13 = pnand %p810_p10, %p1010_p5  ;;  %p755_p0 = scmp.ge.s32.totalorder %s945_s15, 1 }
  0x13   : > { %p158_p1 = scmp.lt.s32.totalorder %s945_s15, 3  ;;  %s138_s9 = scalar_lea.sflag [#allocation3], %s137_s26 }
  0x14   : > { %s849_s10 = sshra.s32 %s149_s5, 4  ;;  %p853_p3 = pneg %p1036_p13  ;;  %s850_s10 = int_to_ptr.hbm [resolvable:$true] %s849_s10 }
  0x15   : > { %s851_s11 = scalar_lea.hbm %s850_s10, 64  ;;  %s856_s20 = scalar_lea.hbm %s1170_s0, 128 }
  0x16   : > { %p852_p2 = scmp.ne.s32.totalorder %s850_s10, %s851_s11  ;;  %p857_p5 = scmp.lt.s32.totalorder %s850_s10, %s1170_s0 }
  0x17   : > { %p858_p8 = scmp.lt.s32.totalorder %s856_s20, %s851_s11 }
  0x18   : > { %p854_p4 = pnand %p853_p3, %p852_p2 }
  0x19   : > { %p859_p10 = por %p858_p8, %p857_p5 }
  0x1a   : > { %p855_p7 = pneg %p854_p4 }
  0x1c   : > { %p860_p9 = pnand %p859_p10, %p855_p7 }
  0x1e   : > { %863 = shalt.err (!%p860_p9)
}
  0x1f   : > { %s947_s26 = smov 128   ;;  %s948_s28 = smov 8  }
  0x20   : > { %805 = dma.hbm_to_vmem [thread:$0]  (!%p1036_p13), %s149_s5, 1024, %s151_s7, %s138_s9, %s947_s26, %s947_s26, %s948_s28  }
  0x21   : > { %p159_p2 = pnand %p755_p0, %p158_p1 }
  0x22   : > { %s1057_s29 = sand.u32 (!%p159_p2), 1, %s937_s13  }
  0x23   : > { %162 = sbr.rel (%p159_p2) target bundleno = 707 (0x2c3), region = 32  ;;  %s756_s30 = sshll.u32 (!%p159_p2), %s1057_s29, 6 }
  0x24   : > { %s165_s4 = scalar_lea.sflag (!%p159_p2), [#allocation3], %s1057_s29  ;;  %s168_s6 = scalar_lea.vmem (!%p159_p2), [#allocation2], %s756_s30 }
  0x28   : > { %924 = dma.done.wait (%p1014_p6), %s165_s4, 1024  }
  0x29   : > { %926 = vsyncadd (%p1014_p6), %s165_s4, 4294966272  ;;  %v194_v0 = vld [vmem:[%s168_s6] sm:$0xff]  ;;  %v196_v1 = vld [vmem:[%s168_s6 + $0x10] sm:$0xff]  ;;  %vm332_vm0 = vcmask 130048   ;;  %s757_s19 = sshll.u32 %s1057_s29, 7  ;;  %vm641_vm1 = vcmask 261120  }
  0x2a   : > { %202 = vxpose.xlu0.b32.start [1/2] (short) (narrow) %v194_v0, 16  ;;  %234 = vxpose.xlu1.b32.start [1/2] (short) (narrow) %v196_v1, 16  ;;  %v200_v2 = vld [vmem:[%s168_s6 + $0x30] sm:$0xff]  ;;  %v331_v3 = vld [vmem:[%s1171_s1 + $0x8] sm:$0xff]  ;;  %v330_v4 = vld [vmem:[%s1171_s1] sm:$0xff]  ;;  %s1102_s20 = scalar_lea.vmem [#allocation5], %s757_s19 }
  0x2b   : > { %298 = vxpose.xlu2.b32.start [1/2] (short) (narrow) %v200_v2, 16  ;;  %371 = vmatpush.msra.mxu0 %v331_v3  ;;  %v195_v5 = vld [vmem:[%s168_s6 + $0x8] sm:$0xff]  ;;  %v197_v6 = vld [vmem:[%s168_s6 + $0x18] sm:$0xff]  ;;  %v198_v8 = vld [vmem:[%s168_s6 + $0x20] sm:$0xff]  ;;  %s791_s22 = sshll.u32 %s992_s16, 7  ;;  %s672_s30 = sshll.u32 %s1102_s20, 4  ;;  %s673_s30 = int_to_ptr.vmem [resolvable:$true] %s672_s30 }
  0x2c   : > { %792 = vmatpush.msra.mxu3 %v331_v3  ;;  %v201_v7 = vld [vmem:[%s168_s6 + $0x38] sm:$0xff]  ;;  %v199_v9 = vld [vmem:[%s168_s6 + $0x28] sm:$0xff]  ;;  %v526_v23 = vld [vmem:[%s1172_s2] sm:$0xff]  ;;  %s671_s28 = scalar_lea.hbm %s1173_s3, %s791_s22  ;;  %s659_s16 = scalar_lea.sflag [#allocation4], %s1057_s29 }
  0x2d   : > { %372 = vmatpush.msra.mxu0 %v330_v4  ;;  %v527_v22 = vld [vmem:[%s1172_s2 + $0x8] sm:$0xff]  ;;  %s674_s4 = sshll.u32 %s671_s28, 4  ;;  %s899_s9 = scalar_lea.hbm %s1173_s3, 256  ;;  %s675_s4 = int_to_ptr.hbm [resolvable:$true] %s674_s4 }
  0x2e   : > { %793 = vmatpush.msra.mxu3 %v330_v4  ;;  %590 = vmatpush.msra.mxu1 %v527_v22  ;;  %s893_s6 = sshra.s32 %s675_s4, 4  ;;  %s894_s6 = int_to_ptr.hbm [resolvable:$true] %s893_s6 }
  0x2f   : > { %794 = vmatpush.msra.mxu2 %v527_v22  ;;  %s895_s5 = scalar_lea.hbm %s894_s6, 128  ;;  %p900_p0 = scmp.lt.s32.totalorder %s894_s6, %s1173_s3 }
  0x30   : > { %795 = vmatpush.msrb.mxu3 %v527_v22  ;;  %591 = vmatpush.msra.mxu1 %v526_v23  ;;  %p896_p6 = scmp.ne.s32.totalorder %s894_s6, %s895_s5  ;;  %p901_p1 = scmp.lt.s32.totalorder %s899_s9, %s895_s5 }
  0x31   : > { %796 = vmatpush.msra.mxu2 %v526_v23 }
  0x32   : > { %203 = vxpose.xlu0.b32.end [2/2] (short) (narrow) %v195_v5, 16  ;;  %235 = vxpose.xlu1.b32.end [2/2] (short) (narrow) %v197_v6, 16  ;;  %p897_p9 = pnand %p896_p6, %p1021_p11  ;;  %p902_p3 = por %p901_p1, %p900_p0 }
  0x33   : > { %299 = vxpose.xlu2.b32.end [2/2] (short) (narrow) %v201_v7, 16  ;;  %797 = vmatpush.msrb.mxu3 %v526_v23 }
  0x34   : > { %p898_p13 = pneg %p897_p9 }
  0x36   : > { %p903_p4 = pnand %p902_p3, %p898_p13 }
  0x3a   : > { %266 = vxpose.xlu0.b32.start [1/2] (short) (narrow) %v198_v8, 16 }
  0x42   : > { %267 = vxpose.xlu0.b32.end [2/2] (short) (narrow) %v199_v9, 16 }
  0xc4   : > { %v314_v10 = vpop.trf.xlu2 }
  0xc5   : > { %764 = vmatmul.msk.f32.vlgmr.msra.gmra.mxu3 %vm332_vm0, %v314_v10 }
  0xcc   : > { %v315_v12 = vpop.trf.xlu2 }
  0xcd   : > { %765 = vmatmul.msk.f32.gmra.mxu3 %vm332_vm0, %v315_v12 }
  0xce   : > { %v218_v11 = vpop.trf.xlu0  ;;  %v250_v14 = vpop.trf.xlu1 }
  0xcf   : > { %758 = vmatmul.msk.f32.vlgmr.msra.gmra.mxu0 %vm332_vm0, %v218_v11 }
  0xd6   : > { %v219_v13 = vpop.trf.xlu0  ;;  %v251_v15 = vpop.trf.xlu1 }
  0xd7   : > { %759 = vmatmul.msk.f32.gmra.mxu0 %vm332_vm0, %v219_v13 }
  0xde   : > { %v282_v16 = vpop.trf.xlu0 }
  0xdf   : > { %760 = vmatmul.msk.f32.gmra.mxu0 %vm332_vm0, %v250_v14 }
  0xe6   : > { %v283_v17 = vpop.trf.xlu0 }
  0xe7   : > { %761 = vmatmul.msk.f32.gmra.mxu0 %vm332_vm0, %v251_v15 }
  0xef   : > { %762 = vmatmul.msk.f32.gmra.mxu0 %vm332_vm0, %v282_v16 }
  0xf7   : > { %763 = vmatmul.msk.f32.gmra.mxu0 %vm332_vm0, %v283_v17 }
 0x148   : > { %v392_v26 = vpop.f32.mrf.mxu3 }
 0x14c   : > { %v374_v18 = vpop.f32.mrf.mxu0 }
 0x14d   : > { %398 = vxpose.xlu2.b32.start [1/2] (short) (narrow) %v374_v18, 32 }
 0x150   : > { %v395_v27 = vpop.f32.mrf.mxu3 }
 0x154   : > { %v377_v19 = vpop.f32.mrf.mxu0 }
 0x155   : > { %399 = vxpose.xlu2.b32.end [2/2] (short) (narrow) %v377_v19, 32 }
 0x15c   : > { %v380_v20 = vpop.f32.mrf.mxu0 }
 0x15d   : > { %430 = vxpose.xlu1.b32.start [1/2] (short) (narrow) %v380_v20, 32 }
 0x164   : > { %v383_v21 = vpop.f32.mrf.mxu0 }
 0x165   : > { %431 = vxpose.xlu1.b32.end [2/2] (short) (narrow) %v383_v21, 32 }
 0x16c   : > { %v386_v24 = vpop.f32.mrf.mxu0 }
 0x16d   : > { %462 = vxpose.xlu0.b32.start [1/2] (short) (narrow) %v386_v24, 32 }
 0x174   : > { %v389_v25 = vpop.f32.mrf.mxu0 }
 0x175   : > { %463 = vxpose.xlu0.b32.end [2/2] (short) (narrow) %v389_v25, 32 }
 0x17d   : > { %494 = vxpose.xlu1.b32.start [1/2] (short) (narrow) %v392_v26, 32 }
 0x185   : > { %495 = vxpose.xlu1.b32.end [2/2] (short) (narrow) %v395_v27, 32 }
 0x1e6   : > { %v414_v28 = vpop.trf.xlu2 }
 0x1e7   : > { %766 = vmatmul.msk.f32.vlgmr.msra.gmra.mxu1 %vm332_vm0, %v414_v28 }
 0x1ee   : > { %v415_v29 = vpop.trf.xlu2 }
 0x1ef   : > { %767 = vmatmul.msk.f32.gmra.mxu1 %vm332_vm0, %v415_v29 }
 0x1f6   : > { %v416_v30 = vpop.trf.xlu2 }
 0x1f7   : > { %768 = vmatmul.msk.f32.gmra.mxu1 %vm332_vm0, %v416_v30 }
 0x1fe   : > { %v417_v31 = vpop.trf.xlu2 }
 0x1ff   : > { %769 = vmatmul.msk.f32.gmra.mxu1 %vm332_vm0, %v417_v31 }
 0x201   : > { %v446_v32 = vpop.trf.xlu1 }
 0x207   : > { %770 = vmatmul.msk.f32.gmra.mxu1 %vm332_vm0, %v446_v32 }
 0x209   : > { %v447_v33 = vpop.trf.xlu1 }
 0x20f   : > { %771 = vmatmul.msk.f32.gmra.mxu1 %vm332_vm0, %v447_v33 }
 0x211   : > { %v448_v34 = vpop.trf.xlu1  ;;  %v478_v36 = vpop.trf.xlu0 }
 0x212   : > { %772 = vmatmul.msk.f32.vlgmr.msra.gmra.mxu2 %vm332_vm0, %v448_v34 }
 0x219   : > { %v449_v35 = vpop.trf.xlu1  ;;  %v479_v38 = vpop.trf.xlu0 }
 0x21a   : > { %773 = vmatmul.msk.f32.gmra.mxu2 %vm332_vm0, %v449_v35 }
 0x221   : > { %v510_v37 = vpop.trf.xlu1  ;;  %v480_v40 = vpop.trf.xlu0 }
 0x222   : > { %774 = vmatmul.msk.f32.gmra.mxu2 %vm332_vm0, %v478_v36  ;;  %778 = vmatmul.msk.f32.vlgmr.msrb.gmra.mxu3 %vm332_vm0, %v510_v37 }
 0x229   : > { %v511_v39 = vpop.trf.xlu1  ;;  %v481_v42 = vpop.trf.xlu0 }
 0x22a   : > { %775 = vmatmul.msk.f32.gmra.mxu2 %vm332_vm0, %v479_v38  ;;  %779 = vmatmul.msk.f32.gmra.mxu3 %vm332_vm0, %v511_v39 }
 0x231   : > { %v512_v41 = vpop.trf.xlu1 }
 0x232   : > { %776 = vmatmul.msk.f32.gmra.mxu2 %vm332_vm0, %v480_v40  ;;  %780 = vmatmul.msk.f32.gmra.mxu3 %vm332_vm0, %v512_v41 }
 0x239   : > { %v513_v43 = vpop.trf.xlu1 }
 0x23a   : > { %777 = vmatmul.msk.f32.gmra.mxu2 %vm332_vm0, %v481_v42  ;;  %781 = vmatmul.msk.f32.gmra.mxu3 %vm332_vm0, %v513_v43 }
 0x264   : > { %v593_v44 = vpop.f32.mrf.mxu1 }
 0x265   : > { %642 = vst.msk [vmem:[%s1102_s20] sm:$0xff] %vm641_vm1, %v593_v44 }
 0x26c   : > { %v596_v45 = vpop.f32.mrf.mxu1 }
 0x26d   : > { %643 = vst.msk [vmem:[%s1102_s20 + $0x8] sm:$0xff] %vm641_vm1, %v596_v45 }
 0x274   : > { %v599_v46 = vpop.f32.mrf.mxu1 }
 0x275   : > { %644 = vst.msk [vmem:[%s1102_s20 + $0x10] sm:$0xff] %vm641_vm1, %v599_v46 }
 0x27c   : > { %v602_v47 = vpop.f32.mrf.mxu1 }
 0x27d   : > { %645 = vst.msk [vmem:[%s1102_s20 + $0x18] sm:$0xff] %vm641_vm1, %v602_v47 }
 0x284   : > { %v605_v48 = vpop.f32.mrf.mxu1 }
 0x285   : > { %646 = vst.msk [vmem:[%s1102_s20 + $0x20] sm:$0xff] %vm641_vm1, %v605_v48 }
 0x28c   : > { %v608_v49 = vpop.f32.mrf.mxu1 }
 0x28d   : > { %647 = vst.msk [vmem:[%s1102_s20 + $0x28] sm:$0xff] %vm641_vm1, %v608_v49 }
 0x295   : > { %v611_v50 = vpop.f32.mrf.mxu2 }
 0x296   : > { %648 = vst.msk [vmem:[%s1102_s20 + $0x30] sm:$0xff] %vm641_vm1, %v611_v50 }
 0x29d   : > { %v614_v51 = vpop.f32.mrf.mxu2 }
 0x29e   : > { %649 = vst.msk [vmem:[%s1102_s20 + $0x38] sm:$0xff] %vm641_vm1, %v614_v51 }
 0x2a5   : > { %v617_v52 = vpop.f32.mrf.mxu2  ;;  %v629_v53 = vpop.f32.mrf.mxu3 }
 0x2a6   : > { %650 = vst.msk [vmem:[%s1102_s20 + $0x40] sm:$0xff] %vm641_vm1, %v617_v52 }
 0x2a7   : > { %654 = vst.msk [vmem:[%s1102_s20 + $0x60] sm:$0xff] %vm641_vm1, %v629_v53 }
 0x2ad   : > { %v620_v54 = vpop.f32.mrf.mxu2  ;;  %v632_v55 = vpop.f32.mrf.mxu3 }
 0x2ae   : > { %651 = vst.msk [vmem:[%s1102_s20 + $0x48] sm:$0xff] %vm641_vm1, %v620_v54 }
 0x2af   : > { %655 = vst.msk [vmem:[%s1102_s20 + $0x68] sm:$0xff] %vm641_vm1, %v632_v55 }
 0x2b5   : > { %v623_v56 = vpop.f32.mrf.mxu2  ;;  %v635_v57 = vpop.f32.mrf.mxu3 }
 0x2b6   : > { %652 = vst.msk [vmem:[%s1102_s20 + $0x50] sm:$0xff] %vm641_vm1, %v623_v56 }
 0x2b7   : > { %656 = vst.msk [vmem:[%s1102_s20 + $0x70] sm:$0xff] %vm641_vm1, %v635_v57 }
 0x2bd   : > { %v626_v58 = vpop.f32.mrf.mxu2  ;;  %v638_v59 = vpop.f32.mrf.mxu3 }
 0x2be   : > { %653 = vst.msk [vmem:[%s1102_s20 + $0x58] sm:$0xff] %vm641_vm1, %v626_v58 }
 0x2bf   : > { %657 = vst.msk [vmem:[%s1102_s20 + $0x78] sm:$0xff] %vm641_vm1, %v638_v59 }
 0x2c0   : > { %906 = shalt.err (!%p903_p4)
}
 0x2c1   : > { %s949_s29 = smov 128   ;;  %s950_s11 = smov 8  }
 0x2c2   : > { %800 = dma.vmem_to_hbm [thread:$0]  (%p1021_p11), %s673_s30, 2048, %s675_s4, %s659_s16, %s949_s29, %s949_s29, %s950_s11  }
 0x2c3 PF: > { %s689_s17 = sand.u32 1, %s933_s12   ;;  %p1179_p7 = scmp.ge.s32.totalorder %s945_s15, 2 }
 0x2c4   : > { %s690_s19 = scalar_lea.sflag [#allocation4], %s689_s17 }
 0x2c5   : > { %p807_p5 = pnand %p1179_p7, %p1025_p12 }
 0x2c7   : > { %p808_p8 = pneg %p807_p5 }
 0x2c9   : > { %928 = dma.done.wait (%p808_p8), %s690_s19, 2048  }
 0x2ca   : > { %930 = vsyncadd (%p808_p8), %s690_s19, 4294965248  ;;  %p16_p10 = scmp.ge.s32.totalorder %s996_s18, 4   ;;  %s1180_s12 = smov %s937_s13 }
 0x2cb   : > { %s1181_s13 = smov %s941_s14  ;;  %s1182_s14 = smov %s1008_s21 }
 0x2cc   : > { %s1183_s15 = smov %s996_s18  ;;  %18 = sbr.rel (!%p16_p10) target bundleno = 5 (0x5), region = 77 }
 0x2d1   :  { %696 = vsyncpa [#allocation3], 1 }
 0x2d2   :  { %698 = vsyncpa [#allocation3 + $0x1], 1 }
 0x2d3   :  { %699 = vsyncpa [#allocation4], 1 }
 0x2d4   :  { %701 = vsyncpa [#allocation4 + $0x1], 1 }

</bundles_post_ra>
